<compile_context>
chip_gen: v7x
topology: tpu7x:2x2x1
jax: 0.10.0
libtpu: 0.0.40
codegen_flags: <defaults>
</compile_context>

<pallas_src>
import functools

import jax
import jax.numpy as jnp
from jax.experimental import pallas as pl
from jax.experimental.pallas import tpu as pltpu


def _ffn_kernel(x_ref, w13_ref, w2_ref, o_ref, acc_ref, *, th):
    # Grid: (i over M row-tiles [parallel], k over H chunks [arbitrary]).
    # NOTE: correctness relies on k being the innermost, sequentially executed
    # ("arbitrary") axis so k == 0 always runs first for each row tile; the
    # accumulator is never zero-initialized separately.
    k = pl.program_id(1)

    x = x_ref[...]
    # Fused gate+up: (tm, D) @ (D, 2*th) -> (tm, 2*th), f32 accumulation on MXU.
    gu = jnp.dot(x, w13_ref[...], preferred_element_type=jnp.float32)
    g = gu[:, :th]
    u = gu[:, th:]
    h = (g * jax.nn.sigmoid(g)) * u                       # SiLU(gate) * up, f32
    # Partial contribution of this hidden chunk to the output projection.
    partial = jnp.dot(h.astype(w2_ref.dtype), w2_ref[...],
                      preferred_element_type=jnp.float32)

    @pl.when(k == 0)
    def _():
        acc_ref[...] = partial            # first chunk: write (skip zero-init pass)

    @pl.when(k != 0)
    def _():
        acc_ref[...] += partial

    @pl.when(k == pl.num_programs(1) - 1)
    def _():
        o_ref[...] = acc_ref[...].astype(o_ref.dtype)


def _vmem_capacity_bytes():
    try:
        return int(pltpu.get_tpu_info().vmem_capacity_bytes)
    except Exception:
        return 64 << 20          # conservative (v7x-sized) fallback


def _vmem_bytes(tm, th, D, *, itemsize=2, weight_buffers=2):
    """Rough working-set estimate for one grid step (tiles + f32 intermediates)."""
    x_out = 2 * (2 * tm * D * itemsize)                 # x + out, double-buffered
    acc = tm * D * 4                                    # f32 accumulator scratch
    w13 = weight_buffers * (D * 2 * th * itemsize)      # fused gate|up weight block
    w2 = weight_buffers * (th * D * itemsize)           # down-proj weight block
    inter = 2 * (tm * 2 * th * 4) + tm * D * 4          # gu + h (f32) + partial (f32)
    headroom = 8 << 20                                  # spill / compiler scratch
    return x_out + acc + w13 + w2 + inter + headroom


def select_tiles(M, D, H, *, th=256, weight_buffers=2, vmem_budget=None):
    """Pick (tm, th): largest row tile that fits ~3/4 of this chip's VMEM.

    tm is the knob that sets arithmetic intensity (~tm bf16 flops per weight
    byte); th only sets per-step granularity, so it stays small (256).
    """
    th = min(th, H)
    if vmem_budget is None:
        cap = _vmem_capacity_bytes()
        vmem_budget = max(32 << 20, min(cap * 3 // 4, 112 << 20))
    tm = None
    for cand in (1024, 512, 256, 128, 64, 32, 16):       # multiples of 16 (bf16 sublanes)
        if cand > M or M % cand != 0:
            continue
        if _vmem_bytes(cand, th, D, weight_buffers=weight_buffers) <= vmem_budget:
            tm = cand
            break
    if tm is None:
        tm = M          # tiny / odd M: single row tile (block == full array dim is legal)
    return tm, th, vmem_budget


def pack_w13(w1, w3, th):
    """Pack w1/w3 (each (D, H)) into one interleaved (D, 2H) matrix.

    Chunk k of the packed matrix is [ w1[:, k*th:(k+1)*th] | w3[:, k*th:(k+1)*th] ],
    so each grid step issues ONE weight DMA and ONE fused MXU dot for gate+up.
    Call this ONCE at weight-load time; the pack-time th must match the kernel th.
    """
    D, H = w1.shape
    assert w3.shape == (D, H)
    assert H % th == 0, "hidden dim must be divisible by the hidden tile"
    n_h = H // th
    w13 = jnp.concatenate(
        [w1.reshape(D, n_h, th), w3.reshape(D, n_h, th)], axis=2
    ).reshape(D, 2 * H)
    return w13.astype(jnp.bfloat16)      # keep the MXU on the fast bf16 path


def feed_forward(x, w13, w2, *, th, tm=None, weight_buffers=2):
    """SwiGLU FFN.  x: (M, D), w13: pre-packed (D, 2H) via pack_w13, w2: (H, D)."""
    M, D = x.shape
    H = w2.shape[0]
    assert w13.shape == (D, 2 * H)

    tm_sel, th_sel, vmem_budget = select_tiles(
        M, D, H, th=th, weight_buffers=weight_buffers)
    if tm is not None:
        tm_sel = min(tm, M)
    tm, th = tm_sel, th_sel

    assert M % tm == 0, "rows must be divisible by the row tile"
    assert H % th == 0, "hidden dim must be divisible by the hidden tile"
    assert th % 128 == 0, "th must be lane-aligned (multiple of 128) for the gu split"
    assert tm == M or tm % 16 == 0, "tm must be a multiple of 16 (bf16 sublane packing)"
    n_h = H // th

    out_dtype = x.dtype
    # Enforce bf16 MXU inputs (f32 matmul is 4x+ slower on v5e/v6e/v7x).
    # Weights should ideally be stored bf16 at load time; cast defensively here.
    if x.dtype == jnp.float32:
        x = x.astype(jnp.bfloat16)
    if w13.dtype == jnp.float32:
        w13 = w13.astype(jnp.bfloat16)
    if w2.dtype == jnp.float32:
        w2 = w2.astype(jnp.bfloat16)

    kernel = functools.partial(_ffn_kernel, th=th)

    # Optional deeper weight prefetch (v5e/v6e only, if DMA is exposed at step
    # boundaries).  Default 2 => plain double-buffering, no pipeline_mode kwarg.
    w_kwargs = {} if weight_buffers == 2 else {"pipeline_mode": pl.Buffered(weight_buffers)}

    # TODO(synk): for decode-like shapes (M // tm == 1) on v7x, split the hidden
    # (k) axis across the two TensorCores and reduce the two partial
    # accumulators via VMEM_SHARED/CMEM to recover ~2x chip throughput.
    return pl.pallas_call(
        kernel,
        out_shape=jax.ShapeDtypeStruct((M, D), out_dtype),
        grid_spec=pltpu.PrefetchScalarGridSpec(
            num_scalar_prefetch=0,
            grid=(M // tm, n_h),
            in_specs=[
                pl.BlockSpec((tm, D), lambda i, k: (i, 0)),                # x row tile
                pl.BlockSpec((D, 2 * th), lambda i, k: (0, k), **w_kwargs),  # fused w1|w3
                pl.BlockSpec((th, D), lambda i, k: (k, 0), **w_kwargs),      # w2 chunk
            ],
            out_specs=pl.BlockSpec((tm, D), lambda i, k: (i, 0)),
            scratch_shapes=[pltpu.VMEM((tm, D), jnp.float32)],
        ),
        compiler_params=pltpu.CompilerParams(
            dimension_semantics=("parallel", "arbitrary"),
            vmem_limit_bytes=int(vmem_budget),
        ),
    )(x, w13, w2)


if __name__ == "__main__":
    # Small config: embedding_dim=128 -> hidden_dim = 4 * 128 = 512
    batch, seq, D = 2, 8, 128
    H = 4 * D
    th = min(256, H)     # kernel hidden tile; pack-time th must match

    key = jax.random.PRNGKey(0)
    kx, k1, k2, k3 = jax.random.split(key, 4)

    dtype = jnp.bfloat16  # stream weights/activations in bf16, accumulate in f32
    x = jax.random.normal(kx, (batch, seq, D), dtype=jnp.float32).astype(dtype)
    # nn.Linear-like scale, stored pre-transposed relative to PyTorch (out,in).
    w1 = (jax.random.normal(k1, (D, H), dtype=jnp.float32) / jnp.sqrt(D)).astype(dtype)
    w3 = (jax.random.normal(k3, (D, H), dtype=jnp.float32) / jnp.sqrt(D)).astype(dtype)
    w2 = (jax.random.normal(k2, (H, D), dtype=jnp.float32) / jnp.sqrt(H)).astype(dtype)

    # Pack once at "weight load" time (not per forward call).
    w13 = pack_w13(w1, w3, th)

    x2d = x.reshape(batch * seq, D)
    out = feed_forward(x2d, w13, w2, th=th)   # H=512, th=256 -> 2 reduction steps
    out = out.reshape(batch, seq, D)
    jax.block_until_ready(out)

    # Pure-JAX reference with matching cast points (bf16 inputs, f32 accumulate).
    g = jnp.dot(x2d, w1, preferred_element_type=jnp.float32)
    u = jnp.dot(x2d, w3, preferred_element_type=jnp.float32)
    h = (g * jax.nn.sigmoid(g)) * u
    ref = jnp.dot(h.astype(dtype), w2, preferred_element_type=jnp.float32)
    ref = ref.astype(dtype).reshape(batch, seq, D)

    assert jnp.allclose(out.astype(jnp.float32), ref.astype(jnp.float32),
                        atol=2e-2, rtol=2e-2), "mismatch vs reference"

    print("KERNEL_OK")
</pallas_src>

<mosaic_0001>
module attributes {stable_mosaic.version = 11 : i64} {
  func.func @_ffn_kernel(%arg0: i32, %arg1: i32, %arg2: memref<16x128xbf16, #tpu.memory_space<vmem>>, %arg3: memref<128x512xbf16, #tpu.memory_space<vmem>>, %arg4: memref<256x128xbf16, #tpu.memory_space<vmem>>, %arg5: memref<16x128xbf16, #tpu.memory_space<vmem>>, %arg6: memref<16x128xf32, #tpu.memory_space<vmem>>) attributes {dimension_semantics = [#tpu.dimension_semantics<parallel>, #tpu.dimension_semantics<arbitrary>], iteration_bounds = array<i64: 1, 2>, scalar_prefetch = 0 : i64, scratch_operands = 1 : i64, tpu.core_type = #tpu.core_type<tc>, window_params = [{transform_indices = @transform_0, window_bounds = array<i64: 16, 128>}, {transform_indices = @transform_1, window_bounds = array<i64: 128, 512>}, {transform_indices = @transform_2, window_bounds = array<i64: 256, 128>}, {transform_indices = @transform_3, window_bounds = array<i64: 16, 128>}]} {
    %c0 = arith.constant 0 : index
    %c0_0 = arith.constant 0 : index
    %0 = vector.load %arg2[%c0, %c0_0] : memref<16x128xbf16, #tpu.memory_space<vmem>>, vector<16x128xbf16>
    %c0_1 = arith.constant 0 : index
    %c0_2 = arith.constant 0 : index
    %1 = vector.load %arg3[%c0_1, %c0_2] : memref<128x512xbf16, #tpu.memory_space<vmem>>, vector<128x512xbf16>
    %cst = arith.constant dense<0.000000e+00> : vector<16x512xf32>
    %2 = tpu.matmul %0, %1, %cst {dimension_numbers = #tpu.dot_dimension_numbers<[1], [0], [0], [1], [0, 0, 1, 1], [], []>} : vector<16x128xbf16>, vector<128x512xbf16>, vector<16x512xf32> -> vector<16x512xf32>
    %3 = vector.extract_strided_slice %2 {offsets = [0, 0], sizes = [16, 256], strides = [1, 1]} : vector<16x512xf32> to vector<16x256xf32>
    %4 = vector.extract_strided_slice %2 {offsets = [0, 256], sizes = [16, 256], strides = [1, 1]} : vector<16x512xf32> to vector<16x256xf32>
    %5 = arith.negf %3 : vector<16x256xf32>
    %6 = math.exp %5 : vector<16x256xf32>
    %cst_3 = arith.constant 1.000000e+00 : f32
    %7 = vector.broadcast %cst_3 : f32 to vector<16x256xf32>
    %8 = arith.addf %7, %6 : vector<16x256xf32>
    %9 = arith.divf %7, %8 : vector<16x256xf32>
    %10 = arith.mulf %3, %9 : vector<16x256xf32>
    %11 = arith.mulf %10, %4 : vector<16x256xf32>
    %12 = arith.truncf %11 : vector<16x256xf32> to vector<16x256xbf16>
    %c0_4 = arith.constant 0 : index
    %c0_5 = arith.constant 0 : index
    %13 = vector.load %arg4[%c0_4, %c0_5] : memref<256x128xbf16, #tpu.memory_space<vmem>>, vector<256x128xbf16>
    %cst_6 = arith.constant dense<0.000000e+00> : vector<16x128xf32>
    %14 = tpu.matmul %12, %13, %cst_6 {dimension_numbers = #tpu.dot_dimension_numbers<[1], [0], [0], [1], [0, 0, 1, 1], [], []>} : vector<16x256xbf16>, vector<256x128xbf16>, vector<16x128xf32> -> vector<16x128xf32>
    %c0_i32 = arith.constant 0 : i32
    %15 = arith.cmpi eq, %arg1, %c0_i32 : i32
    %16 = arith.extui %15 : i1 to i32
    %c0_i32_7 = arith.constant 0 : i32
    %17 = arith.cmpi ne, %16, %c0_i32_7 : i32
    scf.if %17 {
      %c0_11 = arith.constant 0 : index
      %c0_12 = arith.constant 0 : index
      %24 = vector.load %arg6[%c0_11, %c0_12] : memref<16x128xf32, #tpu.memory_space<vmem>>, vector<16x128xf32>
      tpu.vector_store %arg6[%c0_11, %c0_12], %14 {strides = array<i32>} : memref<16x128xf32, #tpu.memory_space<vmem>>, vector<16x128xf32>,
    } else {
    }
    %c0_i32_8 = arith.constant 0 : i32
    %18 = arith.cmpi ne, %arg1, %c0_i32_8 : i32
    %19 = arith.extui %18 : i1 to i32
    %c0_i32_9 = arith.constant 0 : i32
    %20 = arith.cmpi ne, %19, %c0_i32_9 : i32
    scf.if %20 {
      %c0_11 = arith.constant 0 : index
      %c0_12 = arith.constant 0 : index
      %24 = vector.load %arg6[%c0_11, %c0_12] : memref<16x128xf32, #tpu.memory_space<vmem>>, vector<16x128xf32>
      %25 = arith.addf %24, %14 : vector<16x128xf32>
      %c0_13 = arith.constant 0 : index
      %c0_14 = arith.constant 0 : index
      %26 = vector.load %arg6[%c0_13, %c0_14] : memref<16x128xf32, #tpu.memory_space<vmem>>, vector<16x128xf32>
      tpu.vector_store %arg6[%c0_13, %c0_14], %25 {strides = array<i32>} : memref<16x128xf32, #tpu.memory_space<vmem>>, vector<16x128xf32>,
    } else {
    }
    %c1_i32 = arith.constant 1 : i32
    %21 = arith.cmpi eq, %arg1, %c1_i32 : i32
    %22 = arith.extui %21 : i1 to i32
    %c0_i32_10 = arith.constant 0 : i32
    %23 = arith.cmpi ne, %22, %c0_i32_10 : i32
    scf.if %23 {
      %c0_11 = arith.constant 0 : index
      %c0_12 = arith.constant 0 : index
      %24 = vector.load %arg6[%c0_11, %c0_12] : memref<16x128xf32, #tpu.memory_space<vmem>>, vector<16x128xf32>
      %25 = arith.truncf %24 : vector<16x128xf32> to vector<16x128xbf16>
      %c0_13 = arith.constant 0 : index
      %c0_14 = arith.constant 0 : index
      %26 = vector.load %arg5[%c0_13, %c0_14] : memref<16x128xbf16, #tpu.memory_space<vmem>>, vector<16x128xbf16>
      tpu.vector_store %arg5[%c0_13, %c0_14], %25 {strides = array<i32>} : memref<16x128xbf16, #tpu.memory_space<vmem>>, vector<16x128xbf16>,
    } else {
    }
    return
  }
  func.func @transform_0(%arg0: i32, %arg1: i32) -> (i32, i32) {
    %c0_i32 = arith.constant 0 : i32
    %c0_i32_0 = arith.constant 0 : i32
    return %arg0, %c0_i32 : i32, i32
  }
  func.func @transform_1(%arg0: i32, %arg1: i32) -> (i32, i32) {
    %c0_i32 = arith.constant 0 : i32
    %c0_i32_0 = arith.constant 0 : i32
    return %c0_i32, %arg1 : i32, i32
  }
  func.func @transform_2(%arg0: i32, %arg1: i32) -> (i32, i32) {
    %c0_i32 = arith.constant 0 : i32
    %c0_i32_0 = arith.constant 0 : i32
    return %arg1, %c0_i32 : i32, i32
  }
  func.func @transform_3(%arg0: i32, %arg1: i32) -> (i32, i32) {
    %c0_i32 = arith.constant 0 : i32
    %c0_i32_0 = arith.constant 0 : i32
    return %arg0, %c0_i32 : i32, i32
  }
}

</mosaic_0001>

<bundles_post_ra>
// kernel: tpu_custom_call.1
= control target key start
LH: loop header
LB: loop body
LE: loop exit
PB: predicated region body
PF: predicated region fallthrough
CT: control target
= control target key end

     0   :  { %8 = vsyncpa [#allocation4], 0  ;;  %s1637_s0 = inlined_call_operand.hbm [shape: bf16[16,128], index: 0, kind: input, shape index: {}]   ;;  %s1638_s1 = inlined_call_operand.hbm [shape: bf16[128,1024], index: 1, kind: input, shape index: {}]   ;;  %s1639_s2 = inlined_call_operand.hbm [shape: bf16[512,128], index: 2, kind: input, shape index: {}]   ;;  %s1640_s3 = inlined_call_operand.hbm [shape: bf16[16,128], index: 3, kind: output, shape index: {}]  }
   0x1   :  { %9 = vsyncpa [#allocation7], 0 }
   0x2   :  { %11 = vsyncpa [#allocation7 + $0x1], 0 }
   0x3   :  { %12 = vsyncpa [#allocation5], 0  ;;  %s1367_s12 = smov 0   ;;  %s1369_s13 = smov 0  }
   0x4   :  { %s1371_s14 = smov 0   ;;  %s1373_s15 = smov 0  }
   0x5   :  { %s1375_s16 = smov 0   ;;  %s1377_s17 = smov 0  }
   0x6 LB: > { %s27_s18 = sadd.s32 1, %s1329_s16  ;;  %s63_s19 = sadd.s32 1, %s1321_s14  ;;  %s1333_s17 = sphi %s1377_s17, %s18_s17   ;;  %s1329_s16 = sphi %s1375_s16, %s1662_s16   ;;  %s1325_s15 = sphi %s1373_s15, %s1661_s15   ;;  %s1321_s14 = sphi %s1371_s14, %s1660_s14   ;;  %s1317_s13 = sphi %s1369_s13, %s1659_s13   ;;  %s1313_s12 = sphi %s1367_s12, %s1658_s12  }
   0x7   : > { %p28_p0 = scmp.ge.s32.totalorder %s27_s18, 2  ;;  %p70_p1 = scmp.ne.s32.totalorder %s1321_s14, %s1317_s13 }
   0x8   : > { %p71_p2 = scmp.eq.s32.totalorder %s1333_s17, 0  ;;  %p1018_p4 = scmp.lt.s32.totalorder %s1333_s17, 2 }
   0x9   : > { %s1664_s18 = smov (%p28_p0, %s27_s18), 0  ;;  %s168_s21 = sand.u32 1, %s1333_s17  }
   0xa   : > { %p72_p3 = por %p71_p2, %p70_p1  ;;  %s60_s20 = ssub.s32 %s1329_s16, %s1664_s18 }
   0xb   : > { %p61_p5 = scmp.eq.s32.totalorder %s60_s20, 0  ;;  %s170_s22 = sand.u32 1, %s1321_s14  }
   0xc   : > { %s963_s23 = sshll.u32 %s1329_s16, 8  ;;  %s891_s25 = sshll.u32 %s170_s22, 8 }
   0xd   : > { %s1411_s24 = scalar_select %p61_p5, %s1321_s14, %s63_s19  }
   0xe   : > { %s1418_s28 = scalar_lea.hbm %s1638_s1, %s963_s23  ;;  %p1420_p6 = pnand %p1018_p4, %p72_p3 }
   0xf   : > { %s172_s30 = scalar_lea.vmem [#allocation6], %s891_s25  ;;  %s1426_s5 = scalar_lea.sflag [#allocation7], %s168_s21 }
  0x10   : > { %s1647_s29 = scalar_select %p1420_p6, 1, 0 }
  0x11   : > { %s179_s4 = sshll.u32 %s172_s30, 4  ;;  %s1161_s6 = scalar_lea.hbm %s1418_s28, 4096  ;;  %s1424_s4 = int_to_ptr.vmem [resolvable:$true] %s179_s4 }
  0x12   : > { %p1162_p7 = scmp.ne.s32.totalorder %s1418_s28, %s1161_s6  ;;  %p1642_p8 = pneg %p1420_p6 }
  0x13   : > { %s1166_s9 = scalar_lea.hbm %s1638_s1, 8192  ;;  %p1167_p11 = scmp.lt.u32.totalorder %s1418_s28, %s1638_s1 }
  0x14   : > { %p1164_p9 = pnand %p1642_p8, %p1162_p7  ;;  %p1168_p12 = scmp.lt.u32.totalorder %s1166_s9, %s1161_s6 }
  0x15   : > { %p1170_p0 = scmp.lt.u32.totalorder %s1161_s6, %s1418_s28 }
  0x16   : > { %p1165_p10 = pneg %p1164_p9  ;;  %p1169_p13 = por %p1168_p12, %p1167_p11 }
  0x18   : > { %p1171_p1 = por %p1170_p0, %p1169_p13 }
  0x1a   : > { %p1172_p2 = pnand %p1171_p1, %p1165_p10 }
  0x1c   : > { %1175 = shalt.err (!%p1172_p2)
}
  0x1d   : > { %s1176_s19 = scalar_lea.vmem %s1424_s4, 4096  ;;  %s1335_s20 = smov [#allocation6]  }
  0x1e   : > { %p1177_p3 = scmp.ne.s32.totalorder %s1424_s4, %s1176_s19  ;;  %s1181_s21 = sshll.u32 %s1335_s20, 4  ;;  %s1182_s21 = int_to_ptr.vmem [resolvable:$false] %s1181_s21 }
  0x1f   : > { %s1183_s23 = scalar_lea.vmem %s1182_s21, 8192  ;;  %p1184_p7 = scmp.lt.s32.totalorder %s1424_s4, %s1182_s21 }
  0x20   : > { %p1179_p4 = pnand %p1177_p3, %p1642_p8  ;;  %p1185_p9 = scmp.lt.s32.totalorder %s1183_s23, %s1176_s19 }
  0x22   : > { %p1180_p5 = pneg %p1179_p4  ;;  %p1186_p11 = por %p1185_p9, %p1184_p7 }
  0x24   : > { %p1187_p12 = pnand %p1186_p11, %p1180_p5 }
  0x26   : > { %1190 = shalt.err (!%p1187_p12)
}
  0x27   : > { %s1336_s25 = smov 512   ;;  %s1337_s26 = smov 256  }
  0x28   : > { %s1338_s27 = smov 16   ;;  %s1455_s30 = sadd.s32 4294967295, %s1333_s17  }
  0x29   : > { %1013 = dma.hbm_to_vmem [thread:$0]  (!%p1420_p6), %s1418_s28, 4096, %s1424_s4, %s1426_s5, %s1336_s25, %s1337_s26, %s1338_s27  }
  0x2a   : > { %p76_p10 = scmp.ne.s32.totalorder %s1317_s13, %s1313_s12  ;;  %p1641_p13 = scmp.eq.s32.totalorder %s1455_s30, 0 }
  0x2b   : > { %p888_p0 = scmp.ge.s32.totalorder %s1333_s17, 1  ;;  %p139_p1 = scmp.lt.s32.totalorder %s1333_s17, 3 }
  0x2c   : > { %p1464_p2 = por %p1641_p13, %p76_p10  ;;  %s1339_s28 = smov [#allocation3]  }
  0x2d   : > { %p1468_p3 = pnand %p888_p0, %p139_p1  ;;  %s154_s4 = sshll.u32 %s1339_s28, 4  ;;  %s1472_s4 = int_to_ptr.vmem [resolvable:$true] %s154_s4 }
  0x2e   : > { %s1648_s6 = scalar_select %p1464_p2, 1, 0 }
  0x2f   : > { %s1649_s7 = scalar_select %p1468_p3, 1, 0 }
  0x30   : > { %p1006_p4 = pneg %p1468_p3  ;;  %s894_s12 = sshll.u32 %s170_s22, 7 }
  0x31   : > { %s964_s8 = sshll.u32 %s1329_s16, 11  ;;  %s193_s20 = scalar_lea.vmem [#allocation8], %s894_s12 }
  0x32   : > { %p1481_p5 = pnand %p1006_p4, %p1641_p13  ;;  %s1488_s19 = scalar_lea.hbm %s1639_s2, %s964_s8 }
  0x33   : > { %s200_s21 = sshll.u32 %s193_s20, 4  ;;  %s1191_s22 = scalar_lea.hbm %s1637_s0, 128  ;;  %s1490_s21 = int_to_ptr.vmem [resolvable:$true] %s200_s21 }
  0x34   : > { %p1192_p7 = scmp.ne.s32.totalorder %s1637_s0, %s1191_s22  ;;  %p1193_p9 = pneg %p1481_p5 }
  0x35   : > { %p1198_p10 = scmp.lt.u32.totalorder %s1191_s22, %s1637_s0 }
  0x36   : > { %p1194_p11 = pnand %p1193_p9, %p1192_p7 }
  0x38   : > { %p1195_p12 = pneg %p1194_p11 }
  0x3a   : > { %p1200_p0 = pnand %p1198_p10, %p1195_p12 }
  0x3c   : > { %1203 = shalt.err (!%p1200_p0)
}
  0x3d   : > { %s1204_s12 = scalar_lea.vmem %s1472_s4, 128  ;;  %p1212_p8 = scmp.lt.s32.totalorder %s1472_s4, %s1472_s4 }
  0x3e   : > { %p1205_p1 = scmp.ne.s32.totalorder %s1472_s4, %s1204_s12  ;;  %p1213_p2 = scmp.lt.s32.totalorder %s1204_s12, %s1204_s12 }
  0x40   : > { %p1207_p4 = pnand %p1205_p1, %p1193_p9  ;;  %p1214_p3 = por %p1213_p2, %p1212_p8 }
  0x42   : > { %p1208_p13 = pneg %p1207_p4 }
  0x44   : > { %p1215_p6 = pnand %p1214_p3, %p1208_p13 }
  0x46   : > { %1218 = shalt.err (!%p1215_p6)
}
  0x47   : > { %s1340_s8 = smov 64   ;;  %s1341_s11 = smov 4  }
  0x48   : > { %1009 = dma.hbm_to_vmem [thread:$0]  (!%p1481_p5), %s1637_s0, 128, %s1472_s4, [#allocation4], %s1340_s8, %s1340_s8, %s1341_s11  }
  0x49   : > { %s1219_s25 = scalar_lea.hbm %s1488_s19, 2048  ;;  %p1651_p6 = scmp.ne.s32.totalorder %s1647_s29, 0 }
  0x4a   : > { %p1220_p8 = scmp.ne.s32.totalorder %s1488_s19, %s1219_s25  ;;  %s1224_s27 = scalar_lea.hbm %s1639_s2, 4096 }
  0x4b   : > { %p1652_p13 = pneg %p1651_p6  ;;  %p1225_p7 = scmp.lt.u32.totalorder %s1488_s19, %s1639_s2 }
  0x4c   : > { %p1226_p9 = scmp.lt.u32.totalorder %s1224_s27, %s1219_s25  ;;  %p1228_p12 = scmp.lt.u32.totalorder %s1219_s25, %s1488_s19 }
  0x4d   : > { %p1222_p2 = pnand %p1220_p8, %p1652_p13 }
  0x4e   : > { %p1227_p11 = por %p1226_p9, %p1225_p7 }
  0x4f   : > { %p1223_p3 = pneg %p1222_p2 }
  0x50   : > { %p1229_p10 = por %p1228_p12, %p1227_p11 }
  0x52   : > { %p1230_p0 = pnand %p1229_p10, %p1223_p3 }
  0x54   : > { %1233 = shalt.err (!%p1230_p0)
}
  0x55   : > { %s1234_s4 = scalar_lea.vmem %s1490_s21, 2048  ;;  %p1653_p1 = pmov %p1652_p13 }
  0x56   : > { %p1235_p5 = scmp.ne.s32.totalorder %s1490_s21, %s1234_s4  ;;  %s1342_s9 = smov [#allocation8]  }
  0x57   : > { %s1239_s12 = sshll.u32 %s1342_s9, 4  ;;  %s1240_s12 = int_to_ptr.vmem [resolvable:$false] %s1239_s12 }
  0x58   : > { %p1237_p4 = pnand %p1235_p5, %p1653_p1  ;;  %s1241_s20 = scalar_lea.vmem %s1240_s12, 4096 }
  0x59   : > { %p1242_p13 = scmp.lt.s32.totalorder %s1490_s21, %s1240_s12  ;;  %p1243_p2 = scmp.lt.s32.totalorder %s1241_s20, %s1234_s4 }
  0x5a   : > { %p1238_p8 = pneg %p1237_p4 }
  0x5b   : > { %p1244_p7 = por %p1243_p2, %p1242_p13 }
  0x5d   : > { %p1245_p9 = pnand %p1244_p7, %p1238_p8 }
  0x5f   : > { %1248 = shalt.err (!%p1245_p9)
}
  0x60   : > { %1016 = dma.hbm_to_vmem [thread:$0]  (!%p1651_p6), %s1488_s19, 2048, %s1490_s21, %s1426_s5, %s1340_s8, %s1340_s8, %s1341_s11  }
  0x61   : > { %p1654_p3 = scmp.ne.s32.totalorder %s1649_s7, 0 }
  0x62   : > { %p1655_p11 = scmp.eq.s32.totalorder (!%p1654_p3), %s1455_s30, 0 }
  0x63   : > { %212 = sbr.rel (%p1654_p3) target bundleno = 658 (0x292), region = 32 }
  0x6a   : > { %1300 = dma.done.wait (%p1655_p11), [#allocation4], 128   ;;  %p1656_p12 = pmov %p1655_p11 }
  0x6b   : > { %s218_s29 = sand.u32 1, %s1455_s30   ;;  %s220_s23 = sand.u32 1, %s1317_s13  }
  0x6c   : > { %1302 = vsyncadd (%p1656_p12), [#allocation4], 4294967168  ;;  %s899_s25 = sshll.u32 %s220_s23, 8  ;;  %s219_s22 = scalar_lea.sflag [#allocation7], %s218_s29 }
  0x6d   : > { %s1553_s26 = scalar_lea.vmem [#allocation6], %s899_s25  ;;  %p1657_p6 = scmp.ne.s32.totalorder %s1648_s6, 0 }
  0x6f   : > { %1304 = dma.done.wait (%p1657_p6), %s219_s22, 6144  }
  0x70   : > { %1306 = vsyncadd (%p1657_p6), %s219_s22, 4294961152  ;;  %v1343_v0 = vmov 0   ;;  %v1080_v1 = vld [vmem:[%s1553_s26 + $0x4] ss:$16 sps:$4 sm:$0xff]   ;;  %v1082_v2 = vld [vmem:[%s1553_s26] ss:$16 sps:$4 sm:$0xff]  }
  0x71   : > { %491 = vmatprep.mubr.bf16.mxu0 %v1343_v0  ;;  %534 = vmatprep.mubr.bf16.mxu1 %v1343_v0  ;;  %v1083_v3 = vld [vmem:[%s1553_s26 + $0x24] ss:$16 sps:$4 sm:$0xff]   ;;  %v1085_v4 = vld [vmem:[%s1553_s26 + $0x20] ss:$16 sps:$4 sm:$0xff]   ;;  %v1101_v8 = vld [vmem:[%s1553_s26 + $0xc] ss:$16 sps:$4 sm:$0xff]  }
  0x72   : > { %459 = vmatprep.subr.bf16.mxu0 %v1080_v1  ;;  %v1086_v5 = vld [vmem:[%s1553_s26 + $0x44] ss:$16 sps:$4 sm:$0xff]   ;;  %v1088_v6 = vld [vmem:[%s1553_s26 + $0x40] ss:$16 sps:$4 sm:$0xff]   ;;  %v1103_v9 = vld [vmem:[%s1553_s26 + $0x8] ss:$16 sps:$4 sm:$0xff]   ;;  %502 = vmatprep.subr.bf16.mxu1 %v1101_v8 }
  0x73   : > { %460 = vmatpush1.bf16.msra.mxu0 %v1082_v2  ;;  %v1089_v7 = vld [vmem:[%s1553_s26 + $0x64] ss:$16 sps:$4 sm:$0xff]   ;;  %v1091_v10 = vld [vmem:[%s1553_s26 + $0x60] ss:$16 sps:$4 sm:$0xff]   ;;  %v1107_v12 = vld [vmem:[%s1553_s26 + $0x2c] ss:$16 sps:$4 sm:$0xff]   ;;  %503 = vmatpush1.bf16.msra.mxu1 %v1103_v9 }
  0x74   : > { %461 = vmatprep.subr.bf16.mxu0 %v1083_v3  ;;  %v1092_v11 = vld [vmem:[%s1553_s26 + $0x84] ss:$16 sps:$4 sm:$0xff]   ;;  %v1109_v13 = vld [vmem:[%s1553_s26 + $0x28] ss:$16 sps:$4 sm:$0xff]   ;;  %504 = vmatprep.subr.bf16.mxu1 %v1107_v12  ;;  %v1094_v14 = vld [vmem:[%s1553_s26 + $0x80] ss:$16 sps:$4 sm:$0xff]  }
  0x75   : > { %v1111_v15 = vld [vmem:[%s1553_s26 + $0x4c] ss:$16 sps:$4 sm:$0xff]   ;;  %v1095_v16 = vld [vmem:[%s1553_s26 + $0xa4] ss:$16 sps:$4 sm:$0xff]   ;;  %v1113_v17 = vld [vmem:[%s1553_s26 + $0x48] ss:$16 sps:$4 sm:$0xff]  }
  0x76   : > { %v1114_v18 = vld [vmem:[%s1553_s26 + $0x6c] ss:$16 sps:$4 sm:$0xff]   ;;  %v1097_v19 = vld [vmem:[%s1553_s26 + $0xa0] ss:$16 sps:$4 sm:$0xff]   ;;  %v1098_v20 = vld [vmem:[%s1553_s26 + $0xc4] ss:$16 sps:$4 sm:$0xff]  }
  0x77   : > { %462 = vmatpush1.bf16.msra.mxu0 %v1085_v4  ;;  %505 = vmatpush1.bf16.msra.mxu1 %v1109_v13  ;;  %v1116_v21 = vld [vmem:[%s1553_s26 + $0x68] ss:$16 sps:$4 sm:$0xff]   ;;  %v1117_v22 = vld [vmem:[%s1553_s26 + $0x8c] ss:$16 sps:$4 sm:$0xff]   ;;  %v1100_v23 = vld [vmem:[%s1553_s26 + $0xc0] ss:$16 sps:$4 sm:$0xff]  }
  0x78   : > { %463 = vmatprep.subr.bf16.mxu0 %v1086_v5  ;;  %506 = vmatprep.subr.bf16.mxu1 %v1111_v15  ;;  %v1104_v24 = vld [vmem:[%s1553_s26 + $0xe4] ss:$16 sps:$4 sm:$0xff]   ;;  %v1119_v25 = vld [vmem:[%s1553_s26 + $0x88] ss:$16 sps:$4 sm:$0xff]   ;;  %v1120_v26 = vld [vmem:[%s1553_s26 + $0xac] ss:$16 sps:$4 sm:$0xff]  }
  0x79   : > { %v1106_v27 = vld [vmem:[%s1553_s26 + $0xe0] ss:$16 sps:$4 sm:$0xff]   ;;  %v1122_v28 = vld [vmem:[%s1553_s26 + $0xa8] ss:$16 sps:$4 sm:$0xff]   ;;  %v1123_v30 = vld [vmem:[%s1553_s26 + $0xcc] ss:$16 sps:$4 sm:$0xff]  }
  0x7a   : > { %v1110_v29 = vld [vmem:[#allocation3] sm:$0xff]   ;;  %s900_s5 = sshll.u32 %s220_s23, 7  ;;  %p954_p10 = scmp.ne.s32.totalorder %s1325_s15, 0 }
  0x7b   : > { %464 = vmatpush1.bf16.msra.mxu0 %v1088_v6  ;;  %507 = vmatpush1.bf16.msra.mxu1 %v1113_v17  ;;  %v1125_v31 = vld [vmem:[%s1553_s26 + $0xc8] ss:$16 sps:$4 sm:$0xff]   ;;  %v1126_v32 = vld [vmem:[%s1553_s26 + $0xec] ss:$16 sps:$4 sm:$0xff]   ;;  %s231_s6 = scalar_lea.vmem [#allocation8], %s900_s5 }
  0x7c   : > { %465 = vmatprep.subr.bf16.mxu0 %v1089_v7  ;;  %508 = vmatprep.subr.bf16.mxu1 %v1114_v18  ;;  %v1128_v33 = vld [vmem:[%s1553_s26 + $0xe8] ss:$16 sps:$4 sm:$0xff]   ;;  %v1129_v34 = vld [vmem:[%s231_s6 + $0x40] sm:$0xff]   ;;  %v1133_v38 = vld [vmem:[%s231_s6 + $0x50] sm:$0xff]  }
  0x7d   : > { %v1130_v35 = vld [vmem:[%s231_s6] sm:$0xff]   ;;  %v1131_v36 = vld [vmem:[%s231_s6 + $0x48] sm:$0xff]   ;;  %v1134_v39 = vld [vmem:[%s231_s6 + $0x10] sm:$0xff]  }
  0x7e   : > { %v1132_v37 = vld [vmem:[%s231_s6 + $0x8] sm:$0xff]   ;;  %v1135_v40 = vld [vmem:[%s231_s6 + $0x58] sm:$0xff]   ;;  %v1137_v42 = vld [vmem:[%s231_s6 + $0x60] sm:$0xff]  }
  0x7f   : > { %466 = vmatpush1.bf16.msra.mxu0 %v1091_v10  ;;  %509 = vmatpush1.bf16.msra.mxu1 %v1116_v21  ;;  %v1136_v41 = vld [vmem:[%s231_s6 + $0x18] sm:$0xff]   ;;  %v1138_v43 = vld [vmem:[%s231_s6 + $0x20] sm:$0xff]   ;;  %v1139_v44 = vld [vmem:[%s231_s6 + $0x68] sm:$0xff]  }
  0x80   : > { %467 = vmatprep.subr.bf16.mxu0 %v1092_v11  ;;  %510 = vmatprep.subr.bf16.mxu1 %v1117_v22  ;;  %v1140_v45 = vld [vmem:[%s231_s6 + $0x28] sm:$0xff]   ;;  %v1141_v46 = vld [vmem:[%s231_s6 + $0x70] sm:$0xff]   ;;  %v1143_v48 = vld [vmem:[%s231_s6 + $0x78] sm:$0xff]  }
  0x81   : > { %v1142_v47 = vld [vmem:[%s231_s6 + $0x30] sm:$0xff]   ;;  %v1144_v49 = vld [vmem:[%s231_s6 + $0x38] sm:$0xff]  }
  0x83   : > { %468 = vmatpush1.bf16.msra.mxu0 %v1094_v14  ;;  %511 = vmatpush1.bf16.msra.mxu1 %v1119_v25 }
  0x84   : > { %469 = vmatprep.subr.bf16.mxu0 %v1095_v16  ;;  %512 = vmatprep.subr.bf16.mxu1 %v1120_v26 }
  0x87   : > { %470 = vmatpush1.bf16.msra.mxu0 %v1097_v19  ;;  %513 = vmatpush1.bf16.msra.mxu1 %v1122_v28 }
  0x88   : > { %471 = vmatprep.subr.bf16.mxu0 %v1098_v20  ;;  %514 = vmatprep.subr.bf16.mxu1 %v1123_v30 }
  0x8b   : > { %472 = vmatpush1.bf16.msra.mxu0 %v1100_v23  ;;  %515 = vmatpush1.bf16.msra.mxu1 %v1125_v31 }
  0x8c   : > { %473 = vmatprep.subr.bf16.mxu0 %v1104_v24  ;;  %516 = vmatprep.subr.bf16.mxu1 %v1126_v32 }
  0x8f   : > { %474 = vmatpush1.bf16.msra.mxu0 %v1106_v27  ;;  %517 = vmatpush1.bf16.msra.mxu1 %v1128_v33 }
  0x90   : > { %972 = vmatprep.subr.bf16.mxu0 %v1129_v34 }
  0x92   : > { %492 = vmatmul.mubr.bf16.vlgmr.msra.gmra.mrb[0].mxu0 %v1110_v29  ;;  %535 = vmatmul.mubr.bf16.vlgmr.msra.gmra.mrb[0].mxu1 %v1110_v29 }
  0x93   : > { %973 = vmatpush3.bf16.msra.mxu0 %v1130_v35 }
  0x94   : > { %974 = vmatprep.subr.bf16.mxu0 %v1131_v36 }
  0x97   : > { %975 = vmatpush3.bf16.msra.mxu0 %v1132_v37 }
  0x98   : > { %976 = vmatprep.subr.bf16.mxu0 %v1133_v38 }
  0x9b   : > { %977 = vmatpush3.bf16.msra.mxu0 %v1134_v39 }
  0x9c   : > { %978 = vmatprep.subr.bf16.mxu0 %v1135_v40 }
  0x9f   : > { %979 = vmatpush3.bf16.msra.mxu0 %v1136_v41 }
  0xa0   : > { %980 = vmatprep.subr.bf16.mxu0 %v1137_v42 }
  0xa3   : > { %981 = vmatpush3.bf16.msra.mxu0 %v1138_v43 }
  0xa4   : > { %982 = vmatprep.subr.bf16.mxu0 %v1139_v44 }
  0xa7   : > { %983 = vmatpush3.bf16.msra.mxu0 %v1140_v45 }
  0xa8   : > { %984 = vmatprep.subr.bf16.mxu0 %v1141_v46 }
  0xab   : > { %985 = vmatpush3.bf16.msra.mxu0 %v1142_v47 }
  0xac   : > { %986 = vmatprep.subr.bf16.mxu0 %v1143_v48 }
  0xaf   : > { %987 = vmatpush3.bf16.msra.mxu0 %v1144_v49 }
 0x165   : > { %v493_v50 = vpop.f32.mrb[0].mxu0  ;;  %v536_v58 = vpop.f32.mrb[0].mxu1 }
 0x166   : > { %v934_v51 = vmul.f32 -1.442695, %v493_v50  ;;  %v495_v52 = vpop.f32.mrb[1].mxu0  ;;  %v538_v59 = vpop.f32.mrb[1].mxu1 }
 0x167   : > { %v935_v53 = vmul.f32 -1.442695, %v495_v52  ;;  %v497_v54 = vpop.f32.mrb[2].mxu0  ;;  %v540_v60 = vpop.f32.mrb[2].mxu1 }
 0x168   : > { %1145 = vpow2.f32 %v934_v51  ;;  %v936_v55 = vmul.f32 -1.442695, %v497_v54  ;;  %v499_v56 = vpop.f32.mrb[3].mxu0  ;;  %v542_v62 = vpop.f32.mrb[3].mxu1 }
 0x169   : > { %1147 = vpow2.f32 %v935_v53  ;;  %v937_v57 = vmul.f32 -1.442695, %v499_v56 }
 0x16a   : > { %1149 = vpow2.f32 %v936_v55 }
 0x16b   : > { %1151 = vpow2.f32 %v937_v57 }
 0x172   : > { %v1146_v61 = vpop.eup %1145 }
 0x173   : > { %v1148_v63 = vpop.eup %1147  ;;  %v557_v0 = vadd.f32 1.0, %v1146_v61 }
 0x174   : > { %v1150_v1 = vpop.eup %1149  ;;  %v558_v2 = vadd.f32 1.0, %v1148_v63 }
 0x175   : > { %v1152_v3 = vpop.eup %1151  ;;  %1153 = vrcp.f32 %v557_v0  ;;  %v559_v4 = vadd.f32 1.0, %v1150_v1 }
 0x176   : > { %1155 = vrcp.f32 %v558_v2  ;;  %v560_v5 = vadd.f32 1.0, %v1152_v3 }
 0x177   : > { %1157 = vrcp.f32 %v559_v4 }
 0x178   : > { %1159 = vrcp.f32 %v560_v5 }
 0x17f   : > { %v1154_v6 = vpop.eup %1153 }
 0x180   : > { %v1156_v7 = vpop.eup %1155  ;;  %v569_v8 = vmul.f32 %v1154_v6, %v493_v50 }
 0x181   : > { %v1158_v9 = vpop.eup %1157  ;;  %v570_v10 = vmul.f32 %v1156_v7, %v495_v52 }
 0x182   : > { %v1160_v11 = vpop.eup %1159  ;;  %v571_v12 = vmul.f32 %v1158_v9, %v497_v54  ;;  %v573_v13 = vmul.f32 %v569_v8, %v536_v58 }
 0x183   : > { %v572_v14 = vmul.f32 %v1160_v11, %v499_v56  ;;  %v574_v15 = vmul.f32 %v570_v10, %v538_v59 }
 0x184   : > { %v575_v16 = vmul.f32 %v571_v12, %v540_v60 }
 0x185   : > { %v576_v17 = vmul.f32 %v572_v14, %v542_v62 }
 0x186   : > { %v577_v18 = vpack.c.bf16 %v575_v16, %v573_v13 }
 0x187   : > { %v578_v19 = vpack.c.bf16 %v576_v17, %v574_v15 }
 0x189   : > { %739 = vmatprep.mubr.bf16.mxu0 %v578_v19 }
 0x18a   : > { %740 = vmatmul.mubr.bf16.vlgmr.msra.gmra.mrb[4].mxu0 %v577_v18 }
 0x25b   : > { %751 = sbr.rel (%p954_p10) target bundleno = 612 (0x264), region = 48 }
 0x25d   : > { %v988_v20 = vpop.f32.mrb[4].mxu0 }
 0x25e   : > { %v989_v21 = vpop.f32.mrb[5].mxu0 }
 0x25f   : > { %v990_v22 = vadd.f32 %v989_v21, %v988_v20  ;;  %v991_v23 = vpop.f32.mrb[6].mxu0 }
 0x260   : > { %v992_v24 = vpop.f32.mrb[7].mxu0 }
 0x261   : > { %v993_v25 = vadd.f32 %v992_v24, %v991_v23  ;;  %752 = vst [vmem:[#allocation2] sm:$0xff] (!%p954_p10), %v990_v22 }
 0x263   : > { %753 = vst [vmem:[#allocation2 + $0x8] sm:$0xff] %v993_v25 }
 0x264 PF: > { %p955_p0 = scmp.eq.s32.totalorder %s1325_s15, 0 }
 0x266   : > { %757 = sbr.rel (%p955_p0) target bundleno = 622 (0x26e), region = 52 }
 0x26a   : > { %v758_v26 = vld [vmem:[#allocation2] sm:$0xff] (!%p955_p0)  ;;  %v759_v27 = vld [vmem:[#allocation2 + $0x8] sm:$0xff] (!%p955_p0) }
 0x26b   : > { %v760_v28 = vadd.f32 (!%p955_p0), %v990_v22, %v758_v26  ;;  %v761_v29 = vadd.f32 (!%p955_p0), %v993_v25, %v759_v27 }
 0x26d   : > { %762 = vst [vmem:[#allocation2] sm:$0xff] %v760_v28  ;;  %763 = vst [vmem:[#allocation2 + $0x8] sm:$0xff] %v761_v29 }
 0x26e PF: > { %p956_p5 = scmp.ne.s32.totalorder %s1325_s15, 1 }
 0x270   : > { %767 = sbr.rel (%p956_p5) target bundleno = 632 (0x278), region = 56 }
 0x274   : > { %v768_v30 = vld [vmem:[#allocation2] sm:$0xff] (!%p956_p5)  ;;  %v769_v31 = vld [vmem:[#allocation2 + $0x8] sm:$0xff] (!%p956_p5) }
 0x275   : > { %v970_v32 = vpack.c.bf16 (!%p956_p5), %v769_v31, %v768_v30 }
 0x277   : > { %971 = vst [vmem:[#allocation9] sm:$0xff] %v970_v32  }
 0x278 PF: > { %p1020_p1 = scmp.eq.s32.totalorder %s1455_s30, 1  ;;  %s1344_s7 = smov [#allocation9]  }
 0x279   : > { %s789_s19 = sshll.u32 %s1344_s7, 4  ;;  %s790_s19 = int_to_ptr.vmem [resolvable:$true] %s789_s19 }
 0x27a   : > { %s1249_s21 = scalar_lea.vmem %s790_s19, 128  ;;  %p1256_p2 = scmp.lt.s32.totalorder %s790_s19, %s790_s19 }
 0x27b   : > { %p1250_p4 = scmp.ne.s32.totalorder %s790_s19, %s1249_s21  ;;  %p1257_p7 = scmp.lt.s32.totalorder %s1249_s21, %s1249_s21 }
 0x27d   : > { %p1251_p8 = pnand %p1250_p4, %p1020_p1  ;;  %p1258_p9 = por %p1257_p7, %p1256_p2 }
 0x27f   : > { %p1252_p13 = pneg %p1251_p8 }
 0x281   : > { %p1259_p3 = pnand %p1258_p9, %p1252_p13 }
 0x283   : > { %1262 = shalt.err (!%p1259_p3)
}
 0x284   : > { %s1263_s11 = scalar_lea.hbm %s1640_s3, 128 }
 0x285   : > { %p1264_p11 = scmp.ne.s32.totalorder %s1640_s3, %s1263_s11  ;;  %p1269_p10 = scmp.lt.u32.totalorder %s1263_s11, %s1640_s3 }
 0x287   : > { %p1265_p12 = pnand %p1264_p11, %p1020_p1 }
 0x289   : > { %p1266_p6 = pneg %p1265_p12 }
 0x28b   : > { %p1271_p0 = pnand %p1269_p10, %p1266_p6 }
 0x28d   : > { %1274 = shalt.err (!%p1271_p0)
}
 0x28e   : > { %s1345_s9 = smov 64   ;;  %s1346_s12 = smov 4  }
 0x28f   : > { %1003 = dma.vmem_to_hbm [thread:$0]  (%p1020_p1), %s790_s19, 128, %s1640_s3, [#allocation5], %s1345_s9, %s1345_s9, %s1346_s12  }
 0x290   : > { %1308 = dma.done.wait (%p1020_p1), [#allocation5], 128  }
 0x291   : > { %1310 = vsyncadd (%p1020_p1), [#allocation5], 4294967168 }
 0x292 PF: > { %s18_s17 = sadd.s32 1, %s1333_s17   ;;  %s1658_s12 = smov %s1317_s13 }
 0x293   : > { %p15_p5 = scmp.ge.s32.totalorder %s18_s17, 4   ;;  %s1659_s13 = smov %s1321_s14 }
 0x294   : > { %s1660_s14 = smov %s1411_s24  ;;  %s1661_s15 = smov %s1329_s16 }
 0x295   : > { %s1662_s16 = smov %s1664_s18  ;;  %17 = sbr.rel (!%p15_p5) target bundleno = 6 (0x6), region = 99 }
 0x29c   :  { %805 = vsyncpa [#allocation4], 1 }
 0x29d   :  { %807 = vsyncpa [#allocation4 + $0x1], 1 }
 0x29e   :  { %808 = vsyncpa [#allocation7], 1 }
 0x29f   :  { %810 = vsyncpa [#allocation7 + $0x1], 1 }
 0x2a0   :  { %811 = vsyncpa [#allocation5], 1 }
 0x2a1   :  { %813 = vsyncpa [#allocation5 + $0x1], 1 }

</bundles_post_ra>
